<compile_context>
chip_gen: v7x
topology: tpu7x:2x2x1
jax: 0.10.0
libtpu: 0.0.40
codegen_flags: <defaults>
</compile_context>

<pallas_src>
import functools
import math

import numpy as np
import jax
import jax.numpy as jnp
from jax.experimental import pallas as pl
from jax.experimental.pallas import tpu as pltpu


def _round_up(x, m):
    return ((x + m - 1) // m) * m


def _diff_and_g0(x, mu, *, sigma, dim):
    """x: (D, T) tile with points on lanes; mu: (D, 1). Returns diff, g0, 1/sig2."""
    inv_sig2 = 1.0 / (sigma * sigma)
    diff = x - mu                                        # (D, T)
    s = jnp.sum(diff * diff, axis=0, keepdims=True)      # (1, T) single XLU reduce
    # prod_d norm*exp(-0.5*diff_d^2/sig2) == exp(-0.5*s/sig2 + D*log(norm)):
    # one EUP exp per point, no product underflow.
    log_norm = -dim * (math.log(sigma) + 0.5 * math.log(2.0 * math.pi))
    g0 = jnp.exp(-0.5 * inv_sig2 * s + log_norm)         # (1, T)
    return diff, g0, inv_sig2


def _g0_kernel(x_ref, mu_ref, g0_ref, *, sigma, dim):
    _, g0, _ = _diff_and_g0(x_ref[...], mu_ref[...], sigma=sigma, dim=dim)
    g0_ref[...] = g0                                     # (1, T)


def _g1_kernel(x_ref, mu_ref, g1_ref, *, sigma, dim):
    diff, g0, inv_sig2 = _diff_and_g0(x_ref[...], mu_ref[...], sigma=sigma, dim=dim)
    z = diff * (-inv_sig2)                               # (D, T)
    g1_ref[...] = z * g0                                 # (D, T) single dense store


def _g2_kernel(x_ref, mu_ref, g2_ref, *, sigma, dim):
    diff, g0, inv_sig2 = _diff_and_g0(x_ref[...], mu_ref[...], sigma=sigma, dim=dim)
    z = diff * (-inv_sig2)                               # (D, T)
    zg = z * g0                                          # (D, T)
    corr = inv_sig2 * g0                                 # (1, T) diagonal correction
    row = jax.lax.broadcasted_iota(jnp.int32, zg.shape, 0)   # (D, T) sublane index
    blocks = []
    for k in range(dim):                                 # static unroll; D is small
        # rows j of block k hold z_k * z_j * g0; fold -1/sig2*g0 into row j == k.
        blk = z[k:k + 1, :] * zg                         # (D, T)
        blk = blk - jnp.where(row == k, corr, 0.0)       # diagonal baked in
        blocks.append(blk)
    # One lane-dense full-tile store instead of 2*D masked partial-sublane stores.
    g2_ref[...] = jnp.concatenate(blocks, axis=0)        # (D*D, T)


def _pick_tile_n(n, rows):
    """Lane-tile size: multiple of 128, double-buffered tiles well inside VMEM
    on every generation (incl. v7x's 64 MiB)."""
    budget = 8 * 1024 * 1024                     # bytes for pipelined tiles
    per_col = 2 * (rows + 2) * 4                 # 2 buffers x f32 rows (+headroom)
    max_t = max(128, (budget // per_col) // 128 * 128)
    return int(min(_round_up(max(n, 1), 128), max_t, 2048))


@functools.partial(jax.jit, static_argnames=("sigma", "diff_order"))
def _gaussian_forward(x, mu, *, sigma, diff_order):
    B, N, D = x.shape

    rows_out = {0: 1, 1: D, 2: D * D}.get(diff_order)
    if rows_out is None:
        raise RuntimeError(
            "higher order derivatives of the gaussian has not bee implemented!")

    # Points on the lane axis: (B, D, N). x is the smallest array involved; this
    # is the only input-side layout op and keeps every kernel vreg lane-dense.
    x_t = jnp.transpose(x.astype(jnp.float32), (0, 2, 1))

    tile_n = _pick_tile_n(N, D + rows_out)
    n_pad = _round_up(N, tile_n)
    if n_pad != N:
        x_t = jnp.pad(x_t, ((0, 0), (0, 0), (0, n_pad - N)))
    mu_col = mu.astype(jnp.float32).reshape(D, 1)

    grid = (B, n_pad // tile_n)
    in_specs = [
        pl.BlockSpec((None, D, tile_n), lambda b, n: (b, 0, n)),
        pl.BlockSpec((D, 1), lambda b, n: (0, 0)),
    ]
    cparams = pltpu.CompilerParams(
        dimension_semantics=("parallel", "parallel"),
        vmem_limit_bytes=32 * 1024 * 1024,
    )

    if diff_order == 0:
        out = pl.pallas_call(
            functools.partial(_g0_kernel, sigma=sigma, dim=D),
            grid=grid,
            in_specs=in_specs,
            out_specs=pl.BlockSpec((None, 1, tile_n), lambda b, n: (b, 0, n)),
            out_shape=jax.ShapeDtypeStruct((B, 1, n_pad), jnp.float32),
            compiler_params=cparams,
        )(x_t, mu_col)
        return out[:, 0, :N]                                   # (B, N)

    if diff_order == 1:
        g1_t = pl.pallas_call(
            functools.partial(_g1_kernel, sigma=sigma, dim=D),
            grid=grid,
            in_specs=in_specs,
            out_specs=pl.BlockSpec((None, D, tile_n), lambda b, n: (b, 0, n)),
            out_shape=jax.ShapeDtypeStruct((B, D, n_pad), jnp.float32),
            compiler_params=cparams,
        )(x_t, mu_col)
        # Only the tensor actually returned is transposed to PyTorch layout.
        return jnp.transpose(g1_t[:, :, :N], (0, 2, 1))        # (B, N, D)

    # diff_order == 2
    g2_t = pl.pallas_call(
        functools.partial(_g2_kernel, sigma=sigma, dim=D),
        grid=grid,
        in_specs=in_specs,
        out_specs=pl.BlockSpec((None, D * D, tile_n), lambda b, n: (b, 0, n)),
        out_shape=jax.ShapeDtypeStruct((B, D * D, n_pad), jnp.float32),
        compiler_params=cparams,
    )(x_t, mu_col)
    g2 = jnp.transpose(g2_t[:, :, :N], (0, 2, 1))              # (B, N, D*D)
    return g2.reshape(B, N, D, D)


class GaussianPallas:
    """Pallas replacement for the PyTorch `Gaussian` module."""

    def __init__(self, mu, sigma):
        self.mu = jnp.asarray(mu, jnp.float32).reshape(-1)   # (D,)
        self.sigma = float(sigma)
        self.dim = int(self.mu.shape[0])

    def forward(self, x, diff_order=0):
        assert x.shape[-1] == self.dim
        return _gaussian_forward(x, self.mu, sigma=self.sigma, diff_order=diff_order)

    __call__ = forward


def _reference(x, mu, sigma):
    # Pure-JAX reference mirroring the PyTorch code (product form) for verification.
    x = x.astype(jnp.float32)
    sig2 = sigma * sigma
    norm = 1.0 / (sigma * np.sqrt(2.0 * np.pi))
    diff = x - mu[None, None, :]                                          # (B, N, D)
    g0 = jnp.prod(norm * jnp.exp(-0.5 * diff ** 2 / sig2), axis=-1)       # (B, N)
    z = -diff / sig2
    g1 = z * g0[:, :, None]
    D = x.shape[-1]
    eye = jnp.eye(D, dtype=x.dtype)
    g2 = (z[:, :, :, None] * z[:, :, None, :] - eye[None, None] / sig2) * g0[:, :, None, None]
    return g0, g1, g2


if __name__ == "__main__":
    B, N, D = 2, 8, 4     # batch, points, gaussian dimension

    key = jax.random.PRNGKey(0)
    kx, kmu = jax.random.split(key)
    x = jax.random.normal(kx, (B, N, D), dtype=jnp.float32)
    mu = jax.random.normal(kmu, (D,), dtype=jnp.float32)
    sigma = 0.8

    gauss = GaussianPallas(mu, sigma)

    g0 = jax.block_until_ready(gauss(x, diff_order=0))
    g1 = jax.block_until_ready(gauss(x, diff_order=1))
    g2 = jax.block_until_ready(gauss(x, diff_order=2))

    r0, r1, r2 = _reference(x, jnp.asarray(mu), sigma)
    assert g0.shape == (B, N) and g1.shape == (B, N, D) and g2.shape == (B, N, D, D)
    np.testing.assert_allclose(np.asarray(g0), np.asarray(r0), rtol=1e-5, atol=1e-6)
    np.testing.assert_allclose(np.asarray(g1), np.asarray(r1), rtol=1e-5, atol=1e-6)
    np.testing.assert_allclose(np.asarray(g2), np.asarray(r2), rtol=1e-5, atol=1e-6)

    print("KERNEL_OK")
</pallas_src>

<mosaic_0001>
module attributes {stable_mosaic.version = 11 : i64} {
  func.func @_g0_kernel(%arg0: i32, %arg1: i32, %arg2: memref<1x4x128xf32, #tpu.memory_space<vmem>>, %arg3: memref<4x1xf32, #tpu.memory_space<vmem>>, %arg4: memref<1x1x128xf32, #tpu.memory_space<vmem>>) attributes {dimension_semantics = [#tpu.dimension_semantics<parallel>, #tpu.dimension_semantics<parallel>], iteration_bounds = array<i64: 2, 1>, scalar_prefetch = 0 : i64, scratch_operands = 0 : i64, tpu.core_type = #tpu.core_type<tc>, window_params = [{transform_indices = @transform_0, window_bounds = array<i64: 1, 4, 128>}, {pipeline_mode = #tpu.pipeline_mode<synchronous>, transform_indices = @transform_1, window_bounds = array<i64: 4, 1>}, {transform_indices = @transform_2, window_bounds = array<i64: 1, 1, 128>}]} {
    %c0 = arith.constant 0 : index
    %c0_0 = arith.constant 0 : index
    %c0_1 = arith.constant 0 : index
    %0 = vector.load %arg2[%c0, %c0_0, %c0_1] : memref<1x4x128xf32, #tpu.memory_space<vmem>>, vector<1x4x128xf32>
    %1 = vector.shape_cast %0 : vector<1x4x128xf32> to vector<4x128xf32>
    %c0_2 = arith.constant 0 : index
    %c0_3 = arith.constant 0 : index
    %2 = vector.load %arg3[%c0_2, %c0_3] : memref<4x1xf32, #tpu.memory_space<vmem>>, vector<4x1xf32>
    %3 = vector.broadcast %2 : vector<4x1xf32> to vector<4x128xf32>
    %4 = arith.subf %1, %3 : vector<4x128xf32>
    %5 = arith.mulf %4, %4 : vector<4x128xf32>
    %cst = arith.constant dense<0.000000e+00> : vector<128xf32>
    %6 = vector.multi_reduction <add>, %5, %cst [0] : vector<4x128xf32> to vector<128xf32>
    %7 = vector.shape_cast %6 : vector<128xf32> to vector<1x128xf32>
    %cst_4 = arith.constant -7.812500e-01 : f32
    %8 = vector.broadcast %cst_4 : f32 to vector<1x128xf32>
    %9 = arith.mulf %8, %7 : vector<1x128xf32>
    %cst_5 = arith.constant -2.783180e+00 : f32
    %10 = vector.broadcast %cst_5 : f32 to vector<1x128xf32>
    %11 = arith.addf %9, %10 : vector<1x128xf32>
    %12 = math.exp %11 : vector<1x128xf32>
    %c0_6 = arith.constant 0 : index
    %c0_7 = arith.constant 0 : index
    %c0_8 = arith.constant 0 : index
    %13 = vector.load %arg4[%c0_6, %c0_7, %c0_8] : memref<1x1x128xf32, #tpu.memory_space<vmem>>, vector<1x1x128xf32>
    %14 = vector.shape_cast %13 : vector<1x1x128xf32> to vector<1x128xf32>
    %15 = vector.shape_cast %12 : vector<1x128xf32> to vector<1x1x128xf32>
    tpu.vector_store %arg4[%c0_6, %c0_7, %c0_8], %15 {strides = array<i32>} : memref<1x1x128xf32, #tpu.memory_space<vmem>>, vector<1x1x128xf32>,
    return
  }
  func.func @transform_0(%arg0: i32, %arg1: i32) -> (i32, i32, i32) {
    %c0_i32 = arith.constant 0 : i32
    %c0_i32_0 = arith.constant 0 : i32
    return %arg0, %c0_i32, %arg1 : i32, i32, i32
  }
  func.func @transform_1(%arg0: i32, %arg1: i32) -> (i32, i32) {
    %c0_i32 = arith.constant 0 : i32
    %c0_i32_0 = arith.constant 0 : i32
    %c0_i32_1 = arith.constant 0 : i32
    return %c0_i32, %c0_i32_0 : i32, i32
  }
  func.func @transform_2(%arg0: i32, %arg1: i32) -> (i32, i32, i32) {
    %c0_i32 = arith.constant 0 : i32
    %c0_i32_0 = arith.constant 0 : i32
    return %arg0, %c0_i32, %arg1 : i32, i32, i32
  }
}

</mosaic_0001>

<bundles_post_ra>
// kernel: _gaussian_forward.1
= control target key start
LH: loop header
LB: loop body
LE: loop exit
PB: predicated region body
PF: predicated region fallthrough
CT: control target
= control target key end

     0   :  { %7 = vsyncpa [#allocation3], 0  ;;  %s546_s0 = inlined_call_operand.vmem [shape: f32[2,4,128], index: 0, kind: input, shape index: {}]   ;;  %s547_s1 = inlined_call_operand.vmem [shape: f32[4,1], index: 1, kind: input, shape index: {}]   ;;  %s548_s2 = inlined_call_operand.hbm [shape: f32[2,1,128], index: 2, kind: output, shape index: {}]  }
   0x1   :  { %9 = vsyncpa [#allocation3 + $0x1], 0  ;;  %s431_s9 = smov 0   ;;  %s433_s10 = smov 0  }
   0x2   :  { %s435_s11 = smov 0   ;;  %s437_s12 = smov 0  }
   0x3   :  { %s439_s13 = smov 0   ;;  %s441_s14 = smov 0  }
   0x4 LB: > { %s266_s15 = sadd.s32 4294967295, %s412_s14   ;;  %s267_s16 = sadd.s32 4294967294, %s412_s14   ;;  %s412_s14 = sphi %s441_s14, %s15_s14   ;;  %s408_s13 = sphi %s439_s13, %s555_s13   ;;  %s404_s12 = sphi %s437_s12, %s554_s12   ;;  %s400_s11 = sphi %s435_s11, %s553_s11   ;;  %s396_s10 = sphi %s433_s10, %s552_s10   ;;  %s392_s9 = sphi %s431_s9, %s551_s9  }
   0x5   : > { %s27_s17 = sadd.s32 1, %s408_s13  ;;  %s85_s18 = sadd.s32 1, %s400_s11 }
   0x6   : > { %p29_p0 = scmp.ge.s32.totalorder %s27_s17, 2  ;;  %p95_p1 = scmp.ne.s32.totalorder %s400_s11, %s396_s10 }
   0x7   : > { %p96_p2 = scmp.eq.s32.totalorder %s266_s15, 1  ;;  %p101_p3 = scmp.ne.s32.totalorder %s396_s10, %s392_s9 }
   0x8   : > { %s557_s17 = smov (%p29_p0, %s27_s17), 0  ;;  %p102_p5 = scmp.eq.s32.totalorder %s267_s16, 1 }
   0x9   : > { %p471_p4 = por %p96_p2, %p95_p1  ;;  %s80_s20 = ssub.s32 %s408_s13, %s557_s17 }
   0xa   : > { %p270_p6 = scmp.ge.s32.totalorder %s412_s14, 1  ;;  %p83_p7 = scmp.eq.s32.totalorder %s80_s20, 0 }
   0xb   : > { %p478_p8 = por %p102_p5, %p101_p3  ;;  %p133_p9 = scmp.lt.s32.totalorder %s412_s14, 3 }
   0xc   : > { %s484_s22 = scalar_select %p83_p7, %s400_s11, %s85_s18  }
   0xd   : > { %p134_p10 = pnand %p270_p6, %p133_p9 }
   0xe   : > { %v164_v0 = vld [vmem:[%s547_s1] sm:$0xf] (!%p134_p10)  ;;  %v414_v1 = vmov (!%p134_p10), 0   ;;  %p156_p11 = scmp.lt.s32.totalorder (!%p134_p10), %s404_s12, 1  ;;  %vm172_vm0 = vcmask (!%p134_p10), 1043456   ;;  %s154_s30 = sand.u32 (!%p134_p10), 1, %s396_s10  }
   0xf   : > { %137 = sbr.rel (%p134_p10) target bundleno = 192 (0xc0), region = 28  ;;  %331 = vset.pattern.permute.xlu0 (!%p134_p10), %v414_v1  ;;  %s272_s3 = sshll.u32 (!%p134_p10), %s404_s12, 4 }
  0x10   : > { %167 = vperm.xlu0 (!%p134_p10), %331, %v164_v0   ;;  %s155_s4 = scalar_lea.vmem (!%p134_p10), [#allocation2], %s154_s30  ;;  %s499_s8 = scalar_lea.hbm (!%p134_p10), %s548_s2, %s272_s3 }
  0x11   : > { %s199_s5 = sshll.u32 (!%p134_p10), %s155_s4, 4  ;;  %s186_s15 = scalar_lea.sflag (!%p134_p10), [#allocation3], %s154_s30  ;;  %s501_s5 = int_to_ptr.vmem [resolvable:$true] %s199_s5 }
  0x12   : > { %s334_s16 = scalar_lea.vmem (!%p134_p10), %s501_s5, 16 }
  0x13   : > { %p335_p12 = scmp.ne.s32.totalorder (!%p134_p10), %s501_s5, %s334_s16 }
  0x15   : > { %p336_p13 = pnand (!%p134_p10), %p335_p12, %p471_p4 }
  0x16   : > { %s157_s25 = scalar_select %p156_p11, %s404_s12, 1 }
  0x17   : > { %p337_p0 = pneg %p336_p13  ;;  %s415_s12 = smov [#allocation2]  }
  0x18   : > { %s271_s26 = sshll.u32 %s157_s25, 2  ;;  %s338_s18 = sshll.u32 %s415_s12, 4  ;;  %s339_s18 = int_to_ptr.vmem [resolvable:$false] %s338_s18 }
  0x19   : > { %s162_s29 = scalar_lea.vmem %s546_s0, %s271_s26  ;;  %s340_s20 = scalar_lea.vmem %s339_s18, 32 }
  0x1a   : > { %v163_v2 = vld [vmem:[%s162_s29] sm:$0xf]  ;;  %p341_p1 = scmp.lt.s32.totalorder %s501_s5, %s339_s18  ;;  %p342_p2 = scmp.lt.s32.totalorder %s340_s20, %s334_s16 }
  0x1c   : > { %p343_p3 = por %p342_p2, %p341_p1 }
  0x1e   : > { %p344_p5 = pnand %p343_p3, %p337_p0 }
  0x8f   : > { %v168_v3 = vpop.permute.xlu0 %167 }
  0x90   : > { %v170_v4 = vsub.f32 %v163_v2, %v168_v3 }
  0x92   : > { %v171_v5 = vmul.f32 %v170_v4, %v170_v4 }
  0x94   : > { %v173_v6 = vsel %vm172_vm0, %v171_v5, 0.0 }
  0x95   : > { %v174_v7 = vrot.slane %v173_v6, 4 }
  0x97   : > { %v175_v8 = vadd.f32 %v174_v7, %v173_v6 }
  0x99   : > { %v176_v9 = vrot.slane %v175_v8, 2 }
  0x9b   : > { %v177_v10 = vadd.f32 %v176_v9, %v175_v8 }
  0x9d   : > { %v178_v11 = vrot.slane %v177_v10, 1 }
  0x9f   : > { %v179_v12 = vadd.f32 %v178_v11, %v177_v10 }
  0xa1   : > { %v180_v13 = vmul.f32 -0.78125, %v179_v12 }
  0xa3   : > { %v181_v14 = vadd.f32 -2.78318, %v180_v13 }
  0xa5   : > { %v182_v15 = vmul.f32 1.442695, %v181_v14 }
  0xa7   : > { %332 = vpow2.f32 %v182_v15 }
  0xb1   : > { %v333_v16 = vpop.eup %332 }
  0xb2   : > { %184 = vst [vmem:[%s155_s4] sm:$0x1] %v333_v16 }
  0xb3   : > { %347 = shalt.err (!%p344_p5)
}
  0xb4   : > { %s348_s23 = scalar_lea.hbm %s499_s8, 16  ;;  %s352_s26 = scalar_lea.hbm %s548_s2, 32 }
  0xb5   : > { %p349_p6 = scmp.ne.s32.totalorder %s499_s8, %s348_s23  ;;  %p353_p10 = scmp.lt.u32.totalorder %s499_s8, %s548_s2 }
  0xb6   : > { %p354_p11 = scmp.lt.u32.totalorder %s352_s26, %s348_s23  ;;  %p356_p13 = scmp.lt.u32.totalorder %s348_s23, %s499_s8 }
  0xb7   : > { %p350_p7 = pnand %p349_p6, %p471_p4 }
  0xb8   : > { %p355_p12 = por %p354_p11, %p353_p10 }
  0xb9   : > { %p351_p9 = pneg %p350_p7 }
  0xba   : > { %p357_p0 = por %p356_p13, %p355_p12 }
  0xbc   : > { %p358_p1 = pnand %p357_p0, %p351_p9 }
  0xbe   : > { %361 = shalt.err (!%p358_p1)
}
  0xbf   : > { %275 = dma.vmem_to_hbm [thread:$0]  (%p471_p4), %s501_s5, 16, %s499_s8, %s186_s15  }
  0xc0 PF: > { %p281_p2 = scmp.ge.s32.totalorder %s412_s14, 2  ;;  %s211_s29 = sand.u32 1, %s392_s9  }
  0xc1   : > { %s212_s30 = scalar_lea.sflag [#allocation3], %s211_s29 }
  0xc2   : > { %p278_p3 = pnand %p281_p2, %p478_p8 }
  0xc4   : > { %387 = dma.done.wait (!%p278_p3), %s212_s30, 16  }
  0xc5   : > { %389 = vsyncadd (!%p278_p3), %s212_s30, 4294967280  ;;  %s15_s14 = sadd.s32 1, %s412_s14   ;;  %s551_s9 = smov %s396_s10 }
  0xc6   : > { %p12_p5 = scmp.ge.s32.totalorder %s15_s14, 4   ;;  %s552_s10 = smov %s400_s11 }
  0xc7   : > { %s553_s11 = smov %s484_s22  ;;  %s554_s12 = smov %s408_s13 }
  0xc8   : > { %s555_s13 = smov %s557_s17  ;;  %14 = sbr.rel (!%p12_p5) target bundleno = 4 (0x4), region = 63 }
  0xcf   :  { %216 = vsyncpa [#allocation3], 1 }
  0xd0   :  { %218 = vsyncpa [#allocation3 + $0x1], 1 }

</bundles_post_ra>
